<compile_context>
chip_gen: v5e
topology: v5e:2x2
jax: 0.10.0
libtpu: 0.0.40
codegen_flags: <defaults>
</compile_context>

<pallas_src>
import functools

import jax
import jax.numpy as jnp
from jax import lax
from jax.experimental import pallas as pl
from jax.experimental.pallas import tpu as pltpu

GAMMA_NEG = 4.0
GAMMA_POS = 1.0
CLIP = 0.05
EPS = 1e-8

SUB_ROWS = 64      # rows processed per inner fori_loop step
MIN_BLOCKS = 8     # target grid steps for large batches (megacore balance)


def _round_up(n, m):
    return (n + m - 1) // m * m


def _int_pow(b, n):
    """b ** n for a static non-negative integer n via square-and-multiply (VPU only)."""
    if n == 0:
        return jnp.ones_like(b)
    result = None
    acc = b
    while n:
        if n & 1:
            result = acc if result is None else result * acc
        n >>= 1
        if n:
            acc = acc * acc
    return result


def _pad_to(v, rows, cols):
    """Zero-pad a small in-register f32 array up to (rows, cols) via concatenation."""
    r, c = v.shape
    if cols != c:
        v = jnp.concatenate([v, jnp.zeros((r, cols - c), v.dtype)], axis=1)
    if rows != r:
        v = jnp.concatenate([v, jnp.zeros((rows - r, cols), v.dtype)], axis=0)
    return v


def _fold_to_vreg(v):
    """Sum an (R, C) f32 array down to one (8, 128) tile using slice+add (VPU only).

    R/C need not be multiples of (8, 128); small in-register zero padding is
    applied first (only triggers for ragged shapes, contributes 0 to the sum).
    """
    R, C = v.shape
    Rp = _round_up(R, 8)
    Cp = _round_up(max(C, 128), 128)
    if (Rp, Cp) != (R, C):
        v = _pad_to(v, Rp, Cp)
    acc = v[0:8, :]
    for i in range(1, Rp // 8):
        acc = acc + v[i * 8:(i + 1) * 8, :]
    out = acc[:, 0:128]
    for j in range(1, Cp // 128):
        out = out + acc[:, j * 128:(j + 1) * 128]
    return out


def _asl_kernel(x_ref, y_ref, out_ref, *, gamma_neg, gamma_pos, clip, eps,
                batch, tile_rows, sub_rows, n_chunks, ragged):
    blk = pl.program_id(0)
    y_is_float = jnp.issubdtype(y_ref.dtype, jnp.floating)

    use_int_pow = (float(gamma_pos).is_integer() and float(gamma_neg).is_integer()
                   and gamma_pos >= 0 and gamma_neg >= 0)

    def chunk_partial(row_in_block, x_raw, y_raw):
        x = x_raw.astype(jnp.float32)
        # y is a multi-label *binarized* target vector: threshold on the raw dtype
        # (no upcast; int8 / bool y keeps streamed bytes minimal).
        is_pos = (y_raw > 0.5) if y_is_float else (y_raw != 0)

        xs_neg = 1.0 - x
        if clip is not None and clip > 0:
            # xs_neg.add_(clip).clamp_(max=1)
            xs_neg = jnp.minimum(xs_neg + clip, 1.0)

        # t*log(max(x,eps)) + (1-t)*log(max(xs_neg,eps)) == log(max(select, eps))
        # for binary t: one EUP log instead of two logs + two muls + one add.
        p = jnp.where(is_pos, x, xs_neg)
        loss = jnp.log(jnp.maximum(p, eps))

        if gamma_neg > 0 or gamma_pos > 0:
            # base = 1 - xs_pos*t - xs_neg*(1-t) == 1 - p for binary t.
            base = 1.0 - p
            if use_int_pow:
                # Default gammas (4, 1): pure VPU multiplies, no exp/log.
                w = jnp.where(is_pos,
                              _int_pow(base, int(gamma_pos)),
                              _int_pow(base, int(gamma_neg)))
            else:
                expo = jnp.where(is_pos, jnp.float32(gamma_pos), jnp.float32(gamma_neg))
                w = jnp.power(base, expo)
            loss = loss * w

        if ragged:
            # Rows past `batch` in the last grid block are garbage (Pallas does not
            # zero out-of-range block data) -> select them to 0 before folding.
            rows = loss.shape[0]
            rid = (blk * tile_rows + row_in_block
                   + lax.broadcasted_iota(jnp.int32, (rows, 1), 0))
            loss = jnp.where(rid < batch, loss, 0.0)

        return _fold_to_vreg(loss)

    if n_chunks == 1:
        acc = chunk_partial(0, x_ref[...], y_ref[...])
    else:
        def body(i, acc):
            r = i * sub_rows
            r_hint = pl.multiple_of(r, sub_rows)
            return acc + chunk_partial(r,
                                       x_ref[pl.ds(r_hint, sub_rows), :],
                                       y_ref[pl.ds(r_hint, sub_rows), :])
        acc = lax.fori_loop(0, n_chunks, body,
                            jnp.zeros((8, 128), jnp.float32),
                            unroll=min(4, n_chunks))

    # Negate in-kernel so the wrapper's final reduction is a plain sum.
    out_ref[...] = -acc


def asymmetric_loss_optimized(x, y, *, gamma_neg=GAMMA_NEG, gamma_pos=GAMMA_POS,
                              clip=CLIP, eps=EPS,
                              target_block_bytes=4 * 1024 * 1024):
    """Pallas implementation of AsymmetricLossOptimized.forward(x, y) -> scalar.

    x: predicted probabilities, (batch, num_classes). Like the reference forward,
       x is used directly (no sigmoid inside). bf16 x is supported (and halves
       HBM traffic); all math is done in f32 after the load.
    y: multi-label *binarized* targets, (batch, num_classes). Prefer int8/bool
       (thresholded in the raw dtype, never upcast). Soft/continuous targets are
       NOT supported by this optimized path.
    """
    assert x.shape == y.shape and x.ndim == 2
    B, C = x.shape

    if y.dtype == jnp.bool_:
        y = y.astype(jnp.int8)   # keep targets 1 byte/element with a plain layout

    # ---- row-tile sizing: total (x + y) bytes per grid step ~ target_block_bytes
    bytes_per_row = C * (jnp.dtype(x.dtype).itemsize + jnp.dtype(y.dtype).itemsize)
    rows_budget = max(8, target_block_bytes // max(bytes_per_row, 1))
    rows_split = max(8, -(-B // MIN_BLOCKS))          # >= MIN_BLOCKS steps for big B
    tile_rows = min(rows_budget, rows_split)
    if tile_rows >= B:
        tile_rows = B          # single block: block dims == full dims (any dtype ok)
    else:
        # Snap to a multiple of 64 (or 32 when the class dim is very wide) so
        # f32 / bf16 / int8 sublane packing is all satisfied.
        snap = SUB_ROWS if rows_budget >= SUB_ROWS else 32
        tile_rows = max(snap, tile_rows // snap * snap)
        if tile_rows >= B:
            tile_rows = B
        # TODO(synk): for extremely wide class counts (block > VMEM budget even at
        # 32 rows) the class axis should also be tiled; not needed for typical
        # multi-label problems (VOC uses 20 classes).
    num_blocks = -(-B // tile_rows)
    ragged = num_blocks * tile_rows != B

    if tile_rows % SUB_ROWS == 0 and tile_rows > SUB_ROWS:
        sub_rows, n_chunks = SUB_ROWS, tile_rows // SUB_ROWS
    else:
        sub_rows, n_chunks = tile_rows, 1

    kernel = functools.partial(
        _asl_kernel, gamma_neg=gamma_neg, gamma_pos=gamma_pos, clip=clip, eps=eps,
        batch=B, tile_rows=tile_rows, sub_rows=sub_rows, n_chunks=n_chunks,
        ragged=ragged)

    cost = pl.CostEstimate(
        flops=int(12 * B * C),
        transcendentals=int(B * C),
        bytes_accessed=int(x.size * jnp.dtype(x.dtype).itemsize
                           + y.size * jnp.dtype(y.dtype).itemsize
                           + num_blocks * 8 * 128 * 4),
    )

    partials = pl.pallas_call(
        kernel,
        out_shape=jax.ShapeDtypeStruct((num_blocks * 8, 128), jnp.float32),
        grid_spec=pltpu.PrefetchScalarGridSpec(
            num_scalar_prefetch=0,
            grid=(num_blocks,),
            in_specs=[
                pl.BlockSpec((tile_rows, C), lambda i: (i, 0)),
                pl.BlockSpec((tile_rows, C), lambda i: (i, 0)),
            ],
            out_specs=pl.BlockSpec((8, 128), lambda i: (i, 0)),
        ),
        compiler_params=pltpu.CompilerParams(
            # Disjoint input/output blocks per step -> truly parallel axis
            # (v7x megacore can split it; harmless on single-TC v5e/v6e).
            dimension_semantics=("parallel",),
            vmem_limit_bytes=32 * 1024 * 1024,
        ),
        cost_estimate=cost,
    )(x, y)

    # Kernel already negated per-block partials: loss = sum of partials.
    return jnp.sum(partials)


def _reference(x, y, gamma_neg=GAMMA_NEG, gamma_pos=GAMMA_POS, clip=CLIP, eps=EPS):
    targets = y
    anti = 1.0 - y
    xs_pos = x
    xs_neg = jnp.minimum(1.0 - x + clip, 1.0)
    loss = targets * jnp.log(jnp.maximum(xs_pos, eps))
    loss = loss + anti * jnp.log(jnp.maximum(xs_neg, eps))
    w = jnp.power(1.0 - xs_pos * targets - xs_neg * anti,
                  gamma_pos * targets + gamma_neg * anti)
    return -(loss * w).sum()


if __name__ == "__main__":
    key = jax.random.PRNGKey(0)

    def check(B, C, tag):
        kx, ky = jax.random.split(jax.random.fold_in(key, tag))
        # x: predicted probabilities in (0.05, 0.95); y: binarized int8 targets.
        x = jax.random.uniform(kx, (B, C), dtype=jnp.float32, minval=0.05, maxval=0.95)
        y = (jax.random.uniform(ky, (B, C)) < 0.3).astype(jnp.int8)
        out = jax.block_until_ready(asymmetric_loss_optimized(x, y))
        ref = _reference(x, y.astype(jnp.float32))
        assert jnp.allclose(out, ref, rtol=1e-4, atol=1e-3), (B, C, out, ref)

    check(16, 128, 0)   # aligned shape, single block
    check(200, 90, 1)   # multi-block grid, ragged last row-block + non-128 class dim
    check(12, 90, 2)    # single small block needing in-register fold padding

    print("KERNEL_OK")
</pallas_src>

<mosaic_0001>
module attributes {stable_mosaic.version = 11 : i64} {
  func.func @_asl_kernel(%arg0: i32, %arg1: memref<16x128xf32, #tpu.memory_space<vmem>>, %arg2: memref<16x128xi8, #tpu.memory_space<vmem>>, %arg3: memref<8x128xf32, #tpu.memory_space<vmem>>) attributes {dimension_semantics = [#tpu.dimension_semantics<parallel>], iteration_bounds = array<i64: 1>, scalar_prefetch = 0 : i64, scratch_operands = 0 : i64, tpu.core_type = #tpu.core_type<tc>, window_params = [{transform_indices = @transform_0, window_bounds = array<i64: 16, 128>}, {transform_indices = @transform_1, window_bounds = array<i64: 16, 128>}, {transform_indices = @transform_2, window_bounds = array<i64: 8, 128>}]} {
    %c0 = arith.constant 0 : index
    %c0_0 = arith.constant 0 : index
    %0 = vector.load %arg1[%c0, %c0_0] : memref<16x128xf32, #tpu.memory_space<vmem>>, vector<16x128xf32>
    %c0_1 = arith.constant 0 : index
    %c0_2 = arith.constant 0 : index
    %1 = vector.load %arg2[%c0_1, %c0_2] : memref<16x128xi8, #tpu.memory_space<vmem>>, vector<16x128xi8>
    %c0_i8 = arith.constant 0 : i8
    %2 = vector.broadcast %c0_i8 : i8 to vector<16x128xi8>
    %3 = arith.cmpi ne, %1, %2 : vector<16x128xi8>
    %cst = arith.constant 1.000000e+00 : f32
    %4 = vector.broadcast %cst : f32 to vector<16x128xf32>
    %5 = arith.subf %4, %0 : vector<16x128xf32>
    %cst_3 = arith.constant 5.000000e-02 : f32
    %6 = vector.broadcast %cst_3 : f32 to vector<16x128xf32>
    %7 = arith.addf %5, %6 : vector<16x128xf32>
    %cst_4 = arith.constant 1.000000e+00 : f32
    %8 = vector.broadcast %cst_4 : f32 to vector<16x128xf32>
    %9 = arith.minimumf %7, %8 : vector<16x128xf32>
    %10 = arith.select %3, %0, %9 : vector<16x128xi1>, vector<16x128xf32>
    %cst_5 = arith.constant 9.99999993E-9 : f32
    %11 = vector.broadcast %cst_5 : f32 to vector<16x128xf32>
    %12 = arith.maximumf %10, %11 : vector<16x128xf32>
    %13 = math.log %12 : vector<16x128xf32>
    %cst_6 = arith.constant 1.000000e+00 : f32
    %14 = vector.broadcast %cst_6 : f32 to vector<16x128xf32>
    %15 = arith.subf %14, %10 : vector<16x128xf32>
    %16 = arith.mulf %15, %15 : vector<16x128xf32>
    %17 = arith.mulf %16, %16 : vector<16x128xf32>
    %18 = arith.select %3, %15, %17 : vector<16x128xi1>, vector<16x128xf32>
    %19 = arith.mulf %13, %18 : vector<16x128xf32>
    %20 = vector.extract_strided_slice %19 {offsets = [0, 0], sizes = [8, 128], strides = [1, 1]} : vector<16x128xf32> to vector<8x128xf32>
    %21 = vector.extract_strided_slice %19 {offsets = [8, 0], sizes = [8, 128], strides = [1, 1]} : vector<16x128xf32> to vector<8x128xf32>
    %22 = arith.addf %20, %21 : vector<8x128xf32>
    %cst_7 = arith.constant 0.000000e+00 : f32
    %23 = vector.broadcast %cst_7 : f32 to vector<8x128xf32>
    %24 = arith.subf %23, %22 : vector<8x128xf32>
    %c0_8 = arith.constant 0 : index
    %c0_9 = arith.constant 0 : index
    %25 = vector.load %arg3[%c0_8, %c0_9] : memref<8x128xf32, #tpu.memory_space<vmem>>, vector<8x128xf32>
    tpu.vector_store %arg3[%c0_8, %c0_9], %24 {strides = array<i32>} : memref<8x128xf32, #tpu.memory_space<vmem>>, vector<8x128xf32>,
    return
  }
  func.func @transform_0(%arg0: i32) -> (i32, i32) {
    %c0_i32 = arith.constant 0 : i32
    %c0_i32_0 = arith.constant 0 : i32
    return %arg0, %c0_i32 : i32, i32
  }
  func.func @transform_1(%arg0: i32) -> (i32, i32) {
    %c0_i32 = arith.constant 0 : i32
    %c0_i32_0 = arith.constant 0 : i32
    return %arg0, %c0_i32 : i32, i32
  }
  func.func @transform_2(%arg0: i32) -> (i32, i32) {
    %c0_i32 = arith.constant 0 : i32
    %c0_i32_0 = arith.constant 0 : i32
    return %arg0, %c0_i32 : i32, i32
  }
}

</mosaic_0001>

<bundles_post_ra>
// kernel: tpu_custom_call.1
= control target key start
LH: loop header
LB: loop body
LE: loop exit
PB: predicated region body
PF: predicated region fallthrough
CT: control target
= control target key end

     0   :  { %7 = vsyncpa [#allocation3], 0  ;;  %s241_s0 = inlined_call_operand.hbm [shape: f32[16,128], index: 0, kind: input, shape index: {}]   ;;  %s242_s1 = inlined_call_operand.hbm [shape: s8[16,128], index: 1, kind: input, shape index: {}]   ;;  %s243_s2 = inlined_call_operand.hbm [shape: f32[8,128], index: 2, kind: output, shape index: {}]  }
   0x1   :  { %8 = vsyncpa [#allocation6], 0 }
   0x2   :  { %9 = vsyncpa [#allocation4], 0  ;;  %s14_s11 = sshll.u32 %s241_s0, 4  ;;  %s193_s12 = smov [#allocation2]   ;;  %s15_s11 = int_to_ptr.hbm [resolvable:$true] %s14_s11 }
   0x3   :  { %s16_s13 = sshll.u32 %s193_s12, 4  ;;  %s27_s16 = sshll.u32 %s242_s1, 4  ;;  %s17_s13 = int_to_ptr.vmem [resolvable:$true] %s16_s13  ;;  %s28_s16 = int_to_ptr.hbm [resolvable:$true] %s27_s16 }
   0x4   :  { %s194_s17 = smov 128   ;;  %s195_s18 = smov 8  }
   0x5   :  { %22 = dma.hbm_to_vmem [thread:$0]  %s15_s11, 256, %s17_s13, [#allocation3], %s194_s17, %s194_s17, %s195_s18  }
   0x6   :  { %s196_s19 = smov [#allocation5]   ;;  %s197_s21 = smov 32  }
   0x7   :  { %s29_s20 = sshll.u32 %s196_s19, 4  ;;  %s198_s22 = smov 2   ;;  %s30_s20 = int_to_ptr.vmem [resolvable:$true] %s29_s20 }
   0x8   :  { %35 = dma.hbm_to_vmem [thread:$0]  %s28_s16, 64, %s30_s20, [#allocation6], %s197_s21, %s197_s21, %s198_s22  }
   0x9   :  { %187 = dma.done.wait [#allocation3], 256  }
   0xa   :  { %188 = vsyncadd [#allocation3], 4294967040 }
   0xb   :  { %189 = dma.done.wait [#allocation6], 64  }
   0xc   :  { %190 = vsyncadd [#allocation6], 4294967232  ;;  %v46_v0 = vld [vmem:[#allocation2] sm:$0xff]  ;;  %v47_v1 = vld [vmem:[#allocation2 + $0x8] sm:$0xff]  ;;  %v199_v6 = vmov 0   ;;  %s200_s0 = smov [#allocation7]  }
   0xd   :  { %v48_v2 = vld [vmem:[#allocation5] sm:$0x3]  ;;  %v49_v3 = vld [vmem:[#allocation5 + $0x2] sm:$0x3]  ;;  %v52_v4 = vsub.f32 1.0, %v46_v0  ;;  %v53_v5 = vsub.f32 1.0, %v47_v1 }
   0xe   :  { %vm50_vm0 = vnez %v48_v2  ;;  %vm51_vm1 = vnez %v49_v3  ;;  %s90_s1 = sshll.u32 %s200_s0, 4  ;;  %s92_s25 = sshll.u32 %s243_s2, 4  ;;  %s91_s1 = int_to_ptr.vmem [resolvable:$true] %s90_s1  ;;  %s93_s25 = int_to_ptr.hbm [resolvable:$true] %s92_s25 }
   0xf   :  { %v58_v7 = vsel %vm50_vm0, 16843009, %v199_v6  ;;  %v54_v8 = vadd.f32 0.05, %v52_v4  ;;  %v55_v9 = vadd.f32 0.05, %v53_v5 }
  0x10   :  { %v59_v10 = vsel %vm51_vm1, 16843009, %v199_v6  ;;  %v60_v11 = vunpack.c.0.s8 %v58_v7 }
  0x11   :  { %v61_v12 = vunpack.c.0.s8 %v59_v10  ;;  %v56_v13 = vmin.f32 %v54_v8, 1.0  ;;  %v57_v14 = vmin.f32 %v55_v9, 1.0 }
  0x12   :  { %vm222_vm2 = vcmp.ne.s32.totalorder %v60_v11, 0 }
  0x13   :  { %vm226_vm3 = vcmp.ne.s32.totalorder %v61_v12, 0  ;;  %v64_v17 = vsel %vm222_vm2, %v46_v0, %v56_v13 }
  0x14   :  { %v65_v18 = vsel %vm226_vm3, %v47_v1, %v57_v14  ;;  %v66_v19 = vmax.f32 %v64_v17, 1e-08  ;;  %v72_v21 = vsub.f32 1.0, %v64_v17 }
  0x15   :  { %v67_v20 = vmax.f32 %v65_v18, 1e-08  ;;  %v73_v22 = vsub.f32 1.0, %v65_v18 }
  0x16   :  { %111 = vlog2.f32 %v66_v19  ;;  %v74_v23 = vmul.f32 %v72_v21, %v72_v21 }
  0x17   :  { %v75_v24 = vmul.f32 %v73_v22, %v73_v22  ;;  %113 = vlog2.f32 %v67_v20 }
  0x18   :  { %v76_v25 = vmul.f32 %v74_v23, %v74_v23 }
  0x19   :  { %v77_v26 = vmul.f32 %v75_v24, %v75_v24 }
  0x1a   :  { %v78_v28 = vsel %vm222_vm2, %v72_v21, %v76_v25 }
  0x1b   :  { %v79_v31 = vsel %vm226_vm3, %v73_v22, %v77_v26 }
  0x1c   :  { %v112_v27 = vpop.eup %111 }
  0x1d   :  { %v114_v29 = vpop.eup %113  ;;  %v69_v30 = vmul.f32 0.6931472, %v112_v27 }
  0x1e   :  { %v71_v32 = vmul.f32 0.6931472, %v114_v29 }
  0x1f   :  { %v80_v33 = vmul.f32 %v78_v28, %v69_v30 }
  0x20   :  { %v81_v34 = vmul.f32 %v79_v31, %v71_v32 }
  0x22   :  { %v82_v35 = vadd.f32 %v81_v34, %v80_v33 }
  0x24   :  { %v83_v36 = vsub.f32 0.0, %v82_v35 }
  0x26   :  { %84 = vst [vmem:[#allocation7] sm:$0xff] %v83_v36 }
  0x27   :  { %95 = dma.vmem_to_hbm [thread:$0]  %s91_s1, 128, %s93_s25, [#allocation4]  }
  0x28   :  { %191 = dma.done.wait [#allocation4], 128  }
  0x29   :  { %192 = vsyncadd [#allocation4], 4294967168 }
  0x2a   :  { %100 = vsyncpa [#allocation3], 1 }
  0x2b   :  { %101 = vsyncpa [#allocation6], 1 }
  0x2c   :  { %102 = vsyncpa [#allocation4], 1 }

</bundles_post_ra>
